<compile_context>
chip_gen: v5e
topology: v5e:2x2
jax: 0.10.0
libtpu: 0.0.40
codegen_flags: <defaults>
</compile_context>

<pallas_src>
import functools

import jax
import jax.numpy as jnp
from jax.experimental import pallas as pl
from jax.experimental.pallas import tpu as pltpu


# ----------------------------------------------------------------------------
# Fused Pallas kernel (one grid step == `imgs` whole images, lanes = imgs*HW)
# ----------------------------------------------------------------------------
def _rfem_kernel(alpha_ref, x_ref, wb_ref, bb_ref, wf_ref, bf_ref,
                 wc_ref, bc_ref, mask_ref,
                 out_ref, diva_ref, multf_ref,
                 *, deltas, Op, O2p, L):
    a = alpha_ref[0]                                      # scalar PReLU slope (SMEM)

    def prelu(v):                                         # shared-alpha PReLU (f32)
        return jnp.maximum(v, 0.0) + a * jnp.minimum(v, 0.0)

    # Hoist the 9 boundary-mask rows once; reused by both im2col passes.
    masks = [mask_ref[t:t + 1, :] for t in range(9)]

    def patches(v):
        """im2col for a 3x3 / pad-1 conv: v (R, L) -> (9R, L) in bf16.

        Block t holds the (dy, dx) shifted neighbourhood of every pixel,
        zeroed outside the image.  Shifts are lane rotations (XLU); the 0/1
        boundary mask makes the cyclic wrap-around (including across image
        boundaries inside the folded-lane block) exact zero padding.
        """
        blocks = []
        for t, d in enumerate(deltas):
            if d % L != 0:
                s = pltpu.roll(v, (-d) % L, axis=1)       # s[:, i] = v[:, i+d]
            else:
                s = v
            blocks.append(s * masks[t])
        return jnp.concatenate(blocks, axis=0).astype(jnp.bfloat16)

    x = x_ref[...]                                        # (Cp, L) raw input
    xa = prelu(x)

    # --- stage 1: con_3_3 / conv_3_1 / conv_1_3 fused -> oam (channel concat)
    oam = jnp.dot(wb_ref[...], patches(xa),
                  preferred_element_type=jnp.float32) + bb_ref[...]   # (O3p, L)
    # TODO(synk): DiVA_attention is undefined in the source; identity pass-through.
    diva_ref[...] = oam

    # --- stage 2: confusion (2O out) & confusion1 (O out) as one 1x1 matmul
    fuse = jnp.dot(wf_ref[...], prelu(oam).astype(jnp.bfloat16),
                   preferred_element_type=jnp.float32) + bf_ref[...]  # (O2p+Op, L)
    cat = fuse[:O2p, :]                                               # confusion
    multf_ref[...] = fuse[O2p:, :]                                    # confusion1

    # --- stage 3: conv1(prelu(cat)) with BN folded in, plus residual x
    y = jnp.dot(wc_ref[...], patches(prelu(cat)),
                preferred_element_type=jnp.float32)                   # (Op, L)
    out_ref[...] = y + bc_ref[...] + x[:Op, :]


# ----------------------------------------------------------------------------
# Parameter folding (plain-JAX glue, outside the kernel)
# ----------------------------------------------------------------------------
def _weight_norm(v, g):
    """torch.nn.utils.weight_norm, dim=0 : w = g * v / ||v|| per out channel."""
    norm = jnp.sqrt(jnp.sum(v * v, axis=(1, 2, 3), keepdims=True))
    return v * (g.reshape(-1, 1, 1, 1) / norm)


def _fold_params(p, C, O, Cp, Op, O2p, O3p):
    """Fused, channel-padded weight matrices (matmul operands cast to bf16)."""
    w33, b33 = p["con_3_3"]["w"], p["con_3_3"]["b"]      # (O, C, 3, 3)
    w31, b31 = p["conv_3_1"]["w"], p["conv_3_1"]["b"]    # (O, C, 3, 1)
    w13, b13 = p["conv_1_3"]["w"], p["conv_1_3"]["b"]    # (O, C, 1, 3)

    # combined 3x3 weight; output rows match torch.cat([con_3_3, conv_3_1, conv_1_3])
    wb9 = jnp.zeros((9, O3p, Cp), jnp.float32)
    for ky in range(3):
        for kx in range(3):
            t = ky * 3 + kx
            wb9 = wb9.at[t, 0:O, 0:C].set(w33[:, :, ky, kx])
            if kx == 1:                                  # conv_3_1: centre column
                wb9 = wb9.at[t, O:2 * O, 0:C].set(w31[:, :, ky, 0])
            if ky == 1:                                  # conv_1_3: centre row
                wb9 = wb9.at[t, 2 * O:3 * O, 0:C].set(w13[:, :, 0, kx])
    wb = jnp.transpose(wb9, (1, 0, 2)).reshape(O3p, 9 * Cp)   # cols: t*Cp + ci
    bb = jnp.zeros((O3p, 1), jnp.float32).at[0:3 * O, 0].set(
        jnp.concatenate([b33, b31, b13]))

    # confusion (2O rows, padded to O2p) + confusion1 (O rows, padded to Op)
    wf = jnp.zeros((O2p + Op, O3p), jnp.float32)
    wf = wf.at[0:2 * O, 0:3 * O].set(p["confusion"]["w"][:, :, 0, 0])
    wf = wf.at[O2p:O2p + O, 0:3 * O].set(p["confusion1"]["w"][:, :, 0, 0])
    bf = jnp.zeros((O2p + Op, 1), jnp.float32)
    bf = bf.at[0:2 * O, 0].set(p["confusion"]["b"])
    bf = bf.at[O2p:O2p + O, 0].set(p["confusion1"]["b"])

    # conv1 with eval-mode BatchNorm folded in
    scale = p["bn_gamma"] * jax.lax.rsqrt(p["bn_var"] + 1e-5)          # (O,)
    w1s = p["conv1"]["w"] * scale[:, None, None, None]                 # (O, 2O, 3, 3)
    wc9 = jnp.zeros((9, Op, O2p), jnp.float32)
    for ky in range(3):
        for kx in range(3):
            t = ky * 3 + kx
            wc9 = wc9.at[t, 0:O, 0:2 * O].set(w1s[:, :, ky, kx])
    wc = jnp.transpose(wc9, (1, 0, 2)).reshape(Op, 9 * O2p)            # cols: t*O2p + ci
    bc = jnp.zeros((Op, 1), jnp.float32).at[0:O, 0].set(
        scale * (p["conv1"]["b"] - p["bn_mean"]) + p["bn_beta"])

    bf16 = jnp.bfloat16
    return wb.astype(bf16), bb, wf.astype(bf16), bf, wc.astype(bf16), bc


def _make_masks(H, W):
    """(9, H*W) 0/1 float masks: tap (dy,dx) valid inside the image."""
    y = jnp.arange(H).reshape(H, 1)
    x = jnp.arange(W).reshape(1, W)
    ms = []
    for dy in (-1, 0, 1):
        for dx in (-1, 0, 1):
            m = ((y + dy >= 0) & (y + dy < H) & (x + dx >= 0) & (x + dx < W))
            ms.append(m.astype(jnp.float32).reshape(H * W))
    return jnp.stack(ms, axis=0)


# ----------------------------------------------------------------------------
# Forward pass
# ----------------------------------------------------------------------------
def rfem_forward(x_nchw, p):
    N, C, H, W = x_nchw.shape
    O = p["bn_gamma"].shape[0]            # out_channels
    assert O == C, "residual `out + x` requires out_channels == in_channels"
    HW = H * W

    pad8 = lambda n: ((n + 7) // 8) * 8
    Cp, Op, O2p, O3p = pad8(C), pad8(O), pad8(2 * O), pad8(3 * O)

    # ---- batch folded into the lane axis: x -> (Cp, N*HW) -------------------
    x_cl = jnp.transpose(x_nchw.reshape(N, C, HW), (1, 0, 2)).reshape(C, N * HW)
    if Cp != C:
        x_cl = jnp.pad(x_cl, ((0, Cp - C), (0, 0)))

    # ---- images per grid step: lane-fat, VMEM-capped, >= 2 steps when N >= 2
    per_lane_bytes = (4 * (2 * Cp + 2 * (2 * Op + O3p)        # dbl-buffered x + outputs
                           + O3p + (O2p + Op) + O2p + 9)      # oam, fuse, prelu(cat), masks
                      + 2 * (9 * Cp + 9 * O2p))               # bf16 im2col temps
    max_imgs_vmem = max(1, (24 * 2 ** 20) // (per_lane_bytes * HW))
    imgs = min(N, max(1, 2048 // HW), max_imgs_vmem)
    if N >= 2:
        imgs = min(imgs, max(1, N // 2))                      # keep both v7x TCs busy
    while N % imgs:
        imgs -= 1
    num_steps = N // imgs
    L = imgs * HW

    wb, bb, wf, bf, wc, bc = _fold_params(p, C, O, Cp, Op, O2p, O3p)
    mask = jnp.tile(_make_masks(H, W), (1, imgs))             # (9, L), periodic/image
    alpha = p["prelu_alpha"].reshape(1).astype(jnp.float32)   # SMEM scalar
    deltas = tuple(dy * W + dx for dy in (-1, 0, 1) for dx in (-1, 0, 1))

    kern = functools.partial(_rfem_kernel, deltas=deltas, Op=Op, O2p=O2p, L=L)
    const = lambda i: (0, 0)
    step = lambda i: (0, i)

    flops = int(2 * N * HW * (O3p * 9 * Cp + (O2p + Op) * O3p + Op * 9 * O2p))
    bytes_accessed = int(4 * (Cp + 2 * Op + O3p) * N * HW + 4 * 9 * L
                         + 2 * (wb.size + wf.size + wc.size)
                         + 4 * (bb.size + bf.size + bc.size))
    vmem_limit = int(min(64 * 2 ** 20, max(32 * 2 ** 20, 2 * per_lane_bytes * L)))

    out, diva, multf = pl.pallas_call(
        kern,
        out_shape=(
            jax.ShapeDtypeStruct((Op, N * HW), jnp.float32),        # out
            jax.ShapeDtypeStruct((O3p, N * HW), jnp.float32),       # out_DiVA
            jax.ShapeDtypeStruct((Op, N * HW), jnp.float32),        # out_Multf
        ),
        grid=(num_steps,),
        in_specs=[
            pl.BlockSpec(memory_space=pltpu.MemorySpace.SMEM),      # prelu alpha (scalar)
            pl.BlockSpec((Cp, L), step),                            # x (channel-padded)
            pl.BlockSpec((O3p, 9 * Cp), const),                     # fused branch weights
            pl.BlockSpec((O3p, 1), const),                          # fused branch bias
            pl.BlockSpec((O2p + Op, O3p), const),                   # fused 1x1 weights
            pl.BlockSpec((O2p + Op, 1), const),                     # fused 1x1 bias
            pl.BlockSpec((Op, 9 * O2p), const),                     # conv1 (+BN) weights
            pl.BlockSpec((Op, 1), const),                           # conv1 (+BN) bias
            pl.BlockSpec((9, L), const),                            # boundary masks
        ],
        out_specs=(
            pl.BlockSpec((Op, L), step),
            pl.BlockSpec((O3p, L), step),
            pl.BlockSpec((Op, L), step),
        ),
        compiler_params=pltpu.CompilerParams(
            dimension_semantics=("parallel",),                      # image chunks across TCs
            vmem_limit_bytes=vmem_limit),
        cost_estimate=pl.CostEstimate(flops=flops, transcendentals=0,
                                      bytes_accessed=bytes_accessed),
    )(alpha, x_cl, wb, bb, wf, bf, wc, bc, mask)

    def unfold(t, rows):
        return jnp.transpose(t[:rows].reshape(rows, N, HW),
                             (1, 0, 2)).reshape(N, rows, H, W)

    return unfold(out, O), unfold(diva, 3 * O), unfold(multf, O)


# ----------------------------------------------------------------------------
# Deterministic parameter construction (mirrors the PyTorch module)
# ----------------------------------------------------------------------------
def make_params(key, in_channels, out_channels):
    C, O = in_channels, out_channels
    keys = iter(jax.random.split(key, 24))

    def conv_p(cout, cin, kh, kw):
        v = 0.1 * jax.random.normal(next(keys), (cout, cin, kh, kw), jnp.float32)
        g = 1.0 + 0.1 * jax.random.normal(next(keys), (cout,), jnp.float32)
        b = 0.1 * jax.random.normal(next(keys), (cout,), jnp.float32)
        return {"w": _weight_norm(v, g), "b": b}

    return {
        "conv_1_3": conv_p(O, C, 1, 3),
        "conv_3_1": conv_p(O, C, 3, 1),
        "con_3_3":  conv_p(O, C, 3, 3),
        "confusion":  conv_p(2 * O, 3 * O, 1, 1),
        "confusion1": conv_p(O, 3 * O, 1, 1),
        "conv1":      conv_p(O, 2 * O, 3, 3),
        "bn_gamma": 1.0 + 0.1 * jax.random.normal(next(keys), (O,), jnp.float32),
        "bn_beta":  0.1 * jax.random.normal(next(keys), (O,), jnp.float32),
        "bn_mean":  0.1 * jax.random.normal(next(keys), (O,), jnp.float32),
        "bn_var":   0.5 + jnp.abs(jax.random.normal(next(keys), (O,), jnp.float32)),
        "prelu_alpha": jnp.full((1,), 0.25, jnp.float32),   # nn.PReLU() default
    }


# ----------------------------------------------------------------------------
if __name__ == "__main__":
    key = jax.random.PRNGKey(0)
    k_x, k_p = jax.random.split(key)

    N, C, H, W = 2, 4, 16, 16            # in_channels == out_channels (residual)
    x = jax.random.normal(k_x, (N, C, H, W), jnp.float32)
    params = make_params(k_p, in_channels=C, out_channels=C)

    fwd = jax.jit(rfem_forward)
    out, out_diva, out_multf = fwd(x, params)
    jax.block_until_ready((out, out_diva, out_multf))

    assert out.shape == (N, C, H, W)
    assert out_diva.shape == (N, 3 * C, H, W)
    assert out_multf.shape == (N, C, H, W)
    assert bool(jnp.all(jnp.isfinite(out)))
    print("KERNEL_OK")
</pallas_src>

<mosaic_0001>
module attributes {stable_mosaic.version = 11 : i64} {
  func.func @_rfem_kernel(%arg0: i32, %arg1: memref<1xf32, #tpu.memory_space<smem>>, %arg2: memref<8x256xf32, #tpu.memory_space<vmem>>, %arg3: memref<16x72xbf16, #tpu.memory_space<vmem>>, %arg4: memref<16x1xf32, #tpu.memory_space<vmem>>, %arg5: memref<16x16xbf16, #tpu.memory_space<vmem>>, %arg6: memref<16x1xf32, #tpu.memory_space<vmem>>, %arg7: memref<8x72xbf16, #tpu.memory_space<vmem>>, %arg8: memref<8x1xf32, #tpu.memory_space<vmem>>, %arg9: memref<9x256xf32, #tpu.memory_space<vmem>>, %arg10: memref<8x256xf32, #tpu.memory_space<vmem>>, %arg11: memref<16x256xf32, #tpu.memory_space<vmem>>, %arg12: memref<8x256xf32, #tpu.memory_space<vmem>>) attributes {dimension_semantics = [#tpu.dimension_semantics<parallel>], iteration_bounds = array<i64: 2>, scalar_prefetch = 0 : i64, scratch_operands = 0 : i64, tpu.core_type = #tpu.core_type<tc>, window_params = [{transform_indices = @transform_0, window_bounds = array<i64: 1>}, {transform_indices = @transform_1, window_bounds = array<i64: 8, 256>}, {pipeline_mode = #tpu.pipeline_mode<synchronous>, transform_indices = @transform_2, window_bounds = array<i64: 16, 72>}, {pipeline_mode = #tpu.pipeline_mode<synchronous>, transform_indices = @transform_3, window_bounds = array<i64: 16, 1>}, {pipeline_mode = #tpu.pipeline_mode<synchronous>, transform_indices = @transform_4, window_bounds = array<i64: 16, 16>}, {pipeline_mode = #tpu.pipeline_mode<synchronous>, transform_indices = @transform_5, window_bounds = array<i64: 16, 1>}, {pipeline_mode = #tpu.pipeline_mode<synchronous>, transform_indices = @transform_6, window_bounds = array<i64: 8, 72>}, {pipeline_mode = #tpu.pipeline_mode<synchronous>, transform_indices = @transform_7, window_bounds = array<i64: 8, 1>}, {pipeline_mode = #tpu.pipeline_mode<synchronous>, transform_indices = @transform_8, window_bounds = array<i64: 9, 256>}, {transform_indices = @transform_9, window_bounds = array<i64: 8, 256>}, {transform_indices = @transform_10, window_bounds = array<i64: 16, 256>}, {transform_indices = @transform_11, window_bounds = array<i64: 8, 256>}]} {
    %c0 = arith.constant 0 : index
    %0 = memref.load %arg1[%c0] : memref<1xf32, #tpu.memory_space<smem>>
    %c0_0 = arith.constant 0 : index
    %c0_1 = arith.constant 0 : index
    %1 = vector.load %arg9[%c0_0, %c0_1] : memref<9x256xf32, #tpu.memory_space<vmem>>, vector<1x256xf32>
    %c1 = arith.constant 1 : index
    %c0_2 = arith.constant 0 : index
    %2 = vector.load %arg9[%c1, %c0_2] : memref<9x256xf32, #tpu.memory_space<vmem>>, vector<1x256xf32>
    %c2 = arith.constant 2 : index
    %c0_3 = arith.constant 0 : index
    %3 = vector.load %arg9[%c2, %c0_3] : memref<9x256xf32, #tpu.memory_space<vmem>>, vector<1x256xf32>
    %c3 = arith.constant 3 : index
    %c0_4 = arith.constant 0 : index
    %4 = vector.load %arg9[%c3, %c0_4] : memref<9x256xf32, #tpu.memory_space<vmem>>, vector<1x256xf32>
    %c4 = arith.constant 4 : index
    %c0_5 = arith.constant 0 : index
    %5 = vector.load %arg9[%c4, %c0_5] : memref<9x256xf32, #tpu.memory_space<vmem>>, vector<1x256xf32>
    %c5 = arith.constant 5 : index
    %c0_6 = arith.constant 0 : index
    %6 = vector.load %arg9[%c5, %c0_6] : memref<9x256xf32, #tpu.memory_space<vmem>>, vector<1x256xf32>
    %c6 = arith.constant 6 : index
    %c0_7 = arith.constant 0 : index
    %7 = vector.load %arg9[%c6, %c0_7] : memref<9x256xf32, #tpu.memory_space<vmem>>, vector<1x256xf32>
    %c7 = arith.constant 7 : index
    %c0_8 = arith.constant 0 : index
    %8 = vector.load %arg9[%c7, %c0_8] : memref<9x256xf32, #tpu.memory_space<vmem>>, vector<1x256xf32>
    %c8 = arith.constant 8 : index
    %c0_9 = arith.constant 0 : index
    %9 = vector.load %arg9[%c8, %c0_9] : memref<9x256xf32, #tpu.memory_space<vmem>>, vector<1x256xf32>
    %c0_10 = arith.constant 0 : index
    %c0_11 = arith.constant 0 : index
    %10 = vector.load %arg2[%c0_10, %c0_11] : memref<8x256xf32, #tpu.memory_space<vmem>>, vector<8x256xf32>
    %cst = arith.constant 0.000000e+00 : f32
    %11 = vector.broadcast %cst : f32 to vector<8x256xf32>
    %12 = arith.maximumf %10, %11 : vector<8x256xf32>
    %cst_12 = arith.constant 0.000000e+00 : f32
    %13 = vector.broadcast %cst_12 : f32 to vector<8x256xf32>
    %14 = arith.minimumf %10, %13 : vector<8x256xf32>
    %15 = vector.broadcast %0 : f32 to vector<8x256xf32>
    %16 = arith.mulf %15, %14 : vector<8x256xf32>
    %17 = arith.addf %12, %16 : vector<8x256xf32>
    %c0_13 = arith.constant 0 : index
    %c0_14 = arith.constant 0 : index
    %18 = vector.load %arg3[%c0_13, %c0_14] : memref<16x72xbf16, #tpu.memory_space<vmem>>, vector<16x72xbf16>
    %c17_i32 = arith.constant 17 : i32
    %19 = tpu.dynamic_rotate %17 by %c17_i32 dim 1 : vector<8x256xf32>, i32 -> vector<8x256xf32>
    %20 = vector.broadcast %1 : vector<1x256xf32> to vector<8x256xf32>
    %21 = arith.mulf %19, %20 : vector<8x256xf32>
    %c16_i32 = arith.constant 16 : i32
    %22 = tpu.dynamic_rotate %17 by %c16_i32 dim 1 : vector<8x256xf32>, i32 -> vector<8x256xf32>
    %23 = vector.broadcast %2 : vector<1x256xf32> to vector<8x256xf32>
    %24 = arith.mulf %22, %23 : vector<8x256xf32>
    %c15_i32 = arith.constant 15 : i32
    %25 = tpu.dynamic_rotate %17 by %c15_i32 dim 1 : vector<8x256xf32>, i32 -> vector<8x256xf32>
    %26 = vector.broadcast %3 : vector<1x256xf32> to vector<8x256xf32>
    %27 = arith.mulf %25, %26 : vector<8x256xf32>
    %c1_i32 = arith.constant 1 : i32
    %28 = tpu.dynamic_rotate %17 by %c1_i32 dim 1 : vector<8x256xf32>, i32 -> vector<8x256xf32>
    %29 = vector.broadcast %4 : vector<1x256xf32> to vector<8x256xf32>
    %30 = arith.mulf %28, %29 : vector<8x256xf32>
    %31 = vector.broadcast %5 : vector<1x256xf32> to vector<8x256xf32>
    %32 = arith.mulf %17, %31 : vector<8x256xf32>
    %c255_i32 = arith.constant 255 : i32
    %33 = tpu.dynamic_rotate %17 by %c255_i32 dim 1 : vector<8x256xf32>, i32 -> vector<8x256xf32>
    %34 = vector.broadcast %6 : vector<1x256xf32> to vector<8x256xf32>
    %35 = arith.mulf %33, %34 : vector<8x256xf32>
    %c241_i32 = arith.constant 241 : i32
    %36 = tpu.dynamic_rotate %17 by %c241_i32 dim 1 : vector<8x256xf32>, i32 -> vector<8x256xf32>
    %37 = vector.broadcast %7 : vector<1x256xf32> to vector<8x256xf32>
    %38 = arith.mulf %36, %37 : vector<8x256xf32>
    %c240_i32 = arith.constant 240 : i32
    %39 = tpu.dynamic_rotate %17 by %c240_i32 dim 1 : vector<8x256xf32>, i32 -> vector<8x256xf32>
    %40 = vector.broadcast %8 : vector<1x256xf32> to vector<8x256xf32>
    %41 = arith.mulf %39, %40 : vector<8x256xf32>
    %c239_i32 = arith.constant 239 : i32
    %42 = tpu.dynamic_rotate %17 by %c239_i32 dim 1 : vector<8x256xf32>, i32 -> vector<8x256xf32>
    %43 = vector.broadcast %9 : vector<1x256xf32> to vector<8x256xf32>
    %44 = arith.mulf %42, %43 : vector<8x256xf32>
    %45 = tpu.concatenate %21, %24, %27, %30, %32, %35, %38, %41, %44 in 0 : vector<8x256xf32>, vector<8x256xf32>, vector<8x256xf32>, vector<8x256xf32>, vector<8x256xf32>, vector<8x256xf32>, vector<8x256xf32>, vector<8x256xf32>, vector<8x256xf32> -> vector<72x256xf32>
    %46 = arith.truncf %45 : vector<72x256xf32> to vector<72x256xbf16>
    %cst_15 = arith.constant dense<0.000000e+00> : vector<16x256xf32>
    %47 = tpu.matmul %18, %46, %cst_15 {dimension_numbers = #tpu.dot_dimension_numbers<[1], [0], [0], [1], [0, 0, 1, 1], [], []>} : vector<16x72xbf16>, vector<72x256xbf16>, vector<16x256xf32> -> vector<16x256xf32>
    %c0_16 = arith.constant 0 : index
    %c0_17 = arith.constant 0 : index
    %48 = vector.load %arg4[%c0_16, %c0_17] : memref<16x1xf32, #tpu.memory_space<vmem>>, vector<16x1xf32>
    %49 = vector.broadcast %48 : vector<16x1xf32> to vector<16x256xf32>
    %50 = arith.addf %47, %49 : vector<16x256xf32>
    %c0_18 = arith.constant 0 : index
    %c0_19 = arith.constant 0 : index
    %51 = vector.load %arg11[%c0_18, %c0_19] : memref<16x256xf32, #tpu.memory_space<vmem>>, vector<16x256xf32>
    tpu.vector_store %arg11[%c0_18, %c0_19], %50 {strides = array<i32>} : memref<16x256xf32, #tpu.memory_space<vmem>>, vector<16x256xf32>,
    %c0_20 = arith.constant 0 : index
    %c0_21 = arith.constant 0 : index
    %52 = vector.load %arg5[%c0_20, %c0_21] : memref<16x16xbf16, #tpu.memory_space<vmem>>, vector<16x16xbf16>
    %cst_22 = arith.constant 0.000000e+00 : f32
    %53 = vector.broadcast %cst_22 : f32 to vector<16x256xf32>
    %54 = arith.maximumf %50, %53 : vector<16x256xf32>
    %cst_23 = arith.constant 0.000000e+00 : f32
    %55 = vector.broadcast %cst_23 : f32 to vector<16x256xf32>
    %56 = arith.minimumf %50, %55 : vector<16x256xf32>
    %57 = vector.broadcast %0 : f32 to vector<16x256xf32>
    %58 = arith.mulf %57, %56 : vector<16x256xf32>
    %59 = arith.addf %54, %58 : vector<16x256xf32>
    %60 = arith.truncf %59 : vector<16x256xf32> to vector<16x256xbf16>
    %cst_24 = arith.constant dense<0.000000e+00> : vector<16x256xf32>
    %61 = tpu.matmul %52, %60, %cst_24 {dimension_numbers = #tpu.dot_dimension_numbers<[1], [0], [0], [1], [0, 0, 1, 1], [], []>} : vector<16x16xbf16>, vector<16x256xbf16>, vector<16x256xf32> -> vector<16x256xf32>
    %c0_25 = arith.constant 0 : index
    %c0_26 = arith.constant 0 : index
    %62 = vector.load %arg6[%c0_25, %c0_26] : memref<16x1xf32, #tpu.memory_space<vmem>>, vector<16x1xf32>
    %63 = vector.broadcast %62 : vector<16x1xf32> to vector<16x256xf32>
    %64 = arith.addf %61, %63 : vector<16x256xf32>
    %65 = vector.extract_strided_slice %64 {offsets = [0, 0], sizes = [8, 256], strides = [1, 1]} : vector<16x256xf32> to vector<8x256xf32>
    %66 = vector.extract_strided_slice %64 {offsets = [8, 0], sizes = [8, 256], strides = [1, 1]} : vector<16x256xf32> to vector<8x256xf32>
    %c0_27 = arith.constant 0 : index
    %c0_28 = arith.constant 0 : index
    %67 = vector.load %arg12[%c0_27, %c0_28] : memref<8x256xf32, #tpu.memory_space<vmem>>, vector<8x256xf32>
    tpu.vector_store %arg12[%c0_27, %c0_28], %66 {strides = array<i32>} : memref<8x256xf32, #tpu.memory_space<vmem>>, vector<8x256xf32>,
    %c0_29 = arith.constant 0 : index
    %c0_30 = arith.constant 0 : index
    %68 = vector.load %arg7[%c0_29, %c0_30] : memref<8x72xbf16, #tpu.memory_space<vmem>>, vector<8x72xbf16>
    %cst_31 = arith.constant 0.000000e+00 : f32
    %69 = vector.broadcast %cst_31 : f32 to vector<8x256xf32>
    %70 = arith.maximumf %65, %69 : vector<8x256xf32>
    %cst_32 = arith.constant 0.000000e+00 : f32
    %71 = vector.broadcast %cst_32 : f32 to vector<8x256xf32>
    %72 = arith.minimumf %65, %71 : vector<8x256xf32>
    %73 = vector.broadcast %0 : f32 to vector<8x256xf32>
    %74 = arith.mulf %73, %72 : vector<8x256xf32>
    %75 = arith.addf %70, %74 : vector<8x256xf32>
    %c17_i32_33 = arith.constant 17 : i32
    %76 = tpu.dynamic_rotate %75 by %c17_i32_33 dim 1 : vector<8x256xf32>, i32 -> vector<8x256xf32>
    %77 = vector.broadcast %1 : vector<1x256xf32> to vector<8x256xf32>
    %78 = arith.mulf %76, %77 : vector<8x256xf32>
    %c16_i32_34 = arith.constant 16 : i32
    %79 = tpu.dynamic_rotate %75 by %c16_i32_34 dim 1 : vector<8x256xf32>, i32 -> vector<8x256xf32>
    %80 = vector.broadcast %2 : vector<1x256xf32> to vector<8x256xf32>
    %81 = arith.mulf %79, %80 : vector<8x256xf32>
    %c15_i32_35 = arith.constant 15 : i32
    %82 = tpu.dynamic_rotate %75 by %c15_i32_35 dim 1 : vector<8x256xf32>, i32 -> vector<8x256xf32>
    %83 = vector.broadcast %3 : vector<1x256xf32> to vector<8x256xf32>
    %84 = arith.mulf %82, %83 : vector<8x256xf32>
    %c1_i32_36 = arith.constant 1 : i32
    %85 = tpu.dynamic_rotate %75 by %c1_i32_36 dim 1 : vector<8x256xf32>, i32 -> vector<8x256xf32>
    %86 = vector.broadcast %4 : vector<1x256xf32> to vector<8x256xf32>
    %87 = arith.mulf %85, %86 : vector<8x256xf32>
    %88 = vector.broadcast %5 : vector<1x256xf32> to vector<8x256xf32>
    %89 = arith.mulf %75, %88 : vector<8x256xf32>
    %c255_i32_37 = arith.constant 255 : i32
    %90 = tpu.dynamic_rotate %75 by %c255_i32_37 dim 1 : vector<8x256xf32>, i32 -> vector<8x256xf32>
    %91 = vector.broadcast %6 : vector<1x256xf32> to vector<8x256xf32>
    %92 = arith.mulf %90, %91 : vector<8x256xf32>
    %c241_i32_38 = arith.constant 241 : i32
    %93 = tpu.dynamic_rotate %75 by %c241_i32_38 dim 1 : vector<8x256xf32>, i32 -> vector<8x256xf32>
    %94 = vector.broadcast %7 : vector<1x256xf32> to vector<8x256xf32>
    %95 = arith.mulf %93, %94 : vector<8x256xf32>
    %c240_i32_39 = arith.constant 240 : i32
    %96 = tpu.dynamic_rotate %75 by %c240_i32_39 dim 1 : vector<8x256xf32>, i32 -> vector<8x256xf32>
    %97 = vector.broadcast %8 : vector<1x256xf32> to vector<8x256xf32>
    %98 = arith.mulf %96, %97 : vector<8x256xf32>
    %c239_i32_40 = arith.constant 239 : i32
    %99 = tpu.dynamic_rotate %75 by %c239_i32_40 dim 1 : vector<8x256xf32>, i32 -> vector<8x256xf32>
    %100 = vector.broadcast %9 : vector<1x256xf32> to vector<8x256xf32>
    %101 = arith.mulf %99, %100 : vector<8x256xf32>
    %102 = tpu.concatenate %78, %81, %84, %87, %89, %92, %95, %98, %101 in 0 : vector<8x256xf32>, vector<8x256xf32>, vector<8x256xf32>, vector<8x256xf32>, vector<8x256xf32>, vector<8x256xf32>, vector<8x256xf32>, vector<8x256xf32>, vector<8x256xf32> -> vector<72x256xf32>
    %103 = arith.truncf %102 : vector<72x256xf32> to vector<72x256xbf16>
    %cst_41 = arith.constant dense<0.000000e+00> : vector<8x256xf32>
    %104 = tpu.matmul %68, %103, %cst_41 {dimension_numbers = #tpu.dot_dimension_numbers<[1], [0], [0], [1], [0, 0, 1, 1], [], []>} : vector<8x72xbf16>, vector<72x256xbf16>, vector<8x256xf32> -> vector<8x256xf32>
    %c0_42 = arith.constant 0 : index
    %c0_43 = arith.constant 0 : index
    %105 = vector.load %arg8[%c0_42, %c0_43] : memref<8x1xf32, #tpu.memory_space<vmem>>, vector<8x1xf32>
    %106 = vector.broadcast %105 : vector<8x1xf32> to vector<8x256xf32>
    %107 = arith.addf %104, %106 : vector<8x256xf32>
    %108 = arith.addf %107, %10 : vector<8x256xf32>
    %c0_44 = arith.constant 0 : index
    %c0_45 = arith.constant 0 : index
    %109 = vector.load %arg10[%c0_44, %c0_45] : memref<8x256xf32, #tpu.memory_space<vmem>>, vector<8x256xf32>
    tpu.vector_store %arg10[%c0_44, %c0_45], %108 {strides = array<i32>} : memref<8x256xf32, #tpu.memory_space<vmem>>, vector<8x256xf32>,
    return
  }
  func.func @transform_0(%arg0: i32) -> i32 {
    %c0_i32 = arith.constant 0 : i32
    %c0_i32_0 = arith.constant 0 : i32
    return %c0_i32 : i32
  }
  func.func @transform_1(%arg0: i32) -> (i32, i32) {
    %c0_i32 = arith.constant 0 : i32
    %c0_i32_0 = arith.constant 0 : i32
    return %c0_i32, %arg0 : i32, i32
  }
  func.func @transform_2(%arg0: i32) -> (i32, i32) {
    %c0_i32 = arith.constant 0 : i32
    %c0_i32_0 = arith.constant 0 : i32
    %c0_i32_1 = arith.constant 0 : i32
    return %c0_i32, %c0_i32_0 : i32, i32
  }
  func.func @transform_3(%arg0: i32) -> (i32, i32) {
    %c0_i32 = arith.constant 0 : i32
    %c0_i32_0 = arith.constant 0 : i32
    %c0_i32_1 = arith.constant 0 : i32
    return %c0_i32, %c0_i32_0 : i32, i32
  }
  func.func @transform_4(%arg0: i32) -> (i32, i32) {
    %c0_i32 = arith.constant 0 : i32
    %c0_i32_0 = arith.constant 0 : i32
    %c0_i32_1 = arith.constant 0 : i32
    return %c0_i32, %c0_i32_0 : i32, i32
  }
  func.func @transform_5(%arg0: i32) -> (i32, i32) {
    %c0_i32 = arith.constant 0 : i32
    %c0_i32_0 = arith.constant 0 : i32
    %c0_i32_1 = arith.constant 0 : i32
    return %c0_i32, %c0_i32_0 : i32, i32
  }
  func.func @transform_6(%arg0: i32) -> (i32, i32) {
    %c0_i32 = arith.constant 0 : i32
    %c0_i32_0 = arith.constant 0 : i32
    %c0_i32_1 = arith.constant 0 : i32
    return %c0_i32, %c0_i32_0 : i32, i32
  }
  func.func @transform_7(%arg0: i32) -> (i32, i32) {
    %c0_i32 = arith.constant 0 : i32
    %c0_i32_0 = arith.constant 0 : i32
    %c0_i32_1 = arith.constant 0 : i32
    return %c0_i32, %c0_i32_0 : i32, i32
  }
  func.func @transform_8(%arg0: i32) -> (i32, i32) {
    %c0_i32 = arith.constant 0 : i32
    %c0_i32_0 = arith.constant 0 : i32
    %c0_i32_1 = arith.constant 0 : i32
    return %c0_i32, %c0_i32_0 : i32, i32
  }
  func.func @transform_9(%arg0: i32) -> (i32, i32) {
    %c0_i32 = arith.constant 0 : i32
    %c0_i32_0 = arith.constant 0 : i32
    return %c0_i32, %arg0 : i32, i32
  }
  func.func @transform_10(%arg0: i32) -> (i32, i32) {
    %c0_i32 = arith.constant 0 : i32
    %c0_i32_0 = arith.constant 0 : i32
    return %c0_i32, %arg0 : i32, i32
  }
  func.func @transform_11(%arg0: i32) -> (i32, i32) {
    %c0_i32 = arith.constant 0 : i32
    %c0_i32_0 = arith.constant 0 : i32
    return %c0_i32, %arg0 : i32, i32
  }
}

</mosaic_0001>

<bundles_post_ra>
// kernel: rfem_forward.1
= control target key start
LH: loop header
LB: loop body
LE: loop exit
PB: predicated region body
PF: predicated region fallthrough
CT: control target
= control target key end

     0   :  { %s1547_s0 = inlined_call_operand.<no memory space> [shape: f32[1], index: 0, kind: input, shape index: {}]   ;;  %s1548_s1 = inlined_call_operand.vmem [shape: f32[8,512], index: 1, kind: input, shape index: {}]   ;;  %s1549_s2 = inlined_call_operand.vmem [shape: bf16[16,72], index: 2, kind: input, shape index: {}]   ;;  %s1550_s3 = inlined_call_operand.vmem [shape: f32[16,1], index: 3, kind: input, shape index: {}]   ;;  %s1551_s4 = inlined_call_operand.vmem [shape: bf16[16,16], index: 4, kind: input, shape index: {}]   ;;  %s1552_s5 = inlined_call_operand.vmem [shape: f32[16,1], index: 5, kind: input, shape index: {}]   ;;  %s1553_s6 = inlined_call_operand.vmem [shape: bf16[8,72], index: 6, kind: input, shape index: {}]   ;;  %s1554_s7 = inlined_call_operand.vmem [shape: f32[8,1], index: 7, kind: input, shape index: {}]   ;;  %s1555_s8 = inlined_call_operand.vmem [shape: f32[9,256], index: 8, kind: input, shape index: {}]   ;;  %s1556_s9 = inlined_call_operand.vmem [shape: f32[8,512], index: 9, kind: output, shape index: {0}]   ;;  %s1557_s10 = inlined_call_operand.vmem [shape: f32[16,512], index: 10, kind: output, shape index: {1}]   ;;  %s1558_s11 = inlined_call_operand.vmem [shape: f32[8,512], index: 11, kind: output, shape index: {2}]  }
   0x1   :  { %17 = sst [smem:[#allocation2]] %s1547_s0 }
   0x2   :  { %s1161_s19 = smov 0   ;;  %s1163_s20 = smov 0  }
   0x3   :  { %s1165_s21 = smov 0  }
   0x4 LB: > { %s1174_s0 = sadd.s32 4294967295, %s1087_s21   ;;  %s1176_s22 = sadd.s32 1, %s1087_s21   ;;  %s1087_s21 = sphi %s1165_s21, %s1565_s21   ;;  %s1083_s20 = sphi %s1163_s20, %s1564_s20   ;;  %s1079_s19 = sphi %s1161_s19, %s1563_s19  }
   0x5   : > { %s247_s23 = ssub.s32 %s1087_s21, %s1176_s22  ;;  %s250_s24 = sadd.s32 1, %s1083_s20 }
   0x6   : > { %p248_p0 = scmp.eq.s32.totalorder %s247_s23, 0  ;;  %p260_p1 = scmp.ne.s32.totalorder %s1083_s20, %s1079_s19 }
   0x7   : > { %p261_p2 = scmp.eq.s32.totalorder %s1174_s0, 1  ;;  %p991_p3 = scmp.ge.s32.totalorder %s1087_s21, 1 }
   0x8   : > { %s1184_s25 = scalar_select %p248_p0, %s1083_s20, %s250_s24  }
   0x9   : > { %p1186_p4 = por %p261_p2, %p260_p1  ;;  %p344_p5 = scmp.lt.s32.totalorder %s1087_s21, 3 }
   0xb   : > { %p345_p6 = pnand %p991_p3, %p344_p5 }
   0xc   : > { %s993_s27 = sshll.u32 (!%p345_p6), %s1174_s0, 1  ;;  %s413_s28 = sld [smem:[#allocation2]] (!%p345_p6) }
   0xd   : > { %348 = sbr.rel (%p345_p6) target bundleno = 782 (0x30e), region = 56  ;;  %p394_p7 = scmp.lt.s32.totalorder (!%p345_p6), %s993_s27, 3 }
   0xe   : > { %s1089_s14 = smov (!%p345_p6), 113   ;;  %s1090_s15 = smov (!%p345_p6), 111  }
   0xf   : > { %s1091_s16 = smov (!%p345_p6), 112   ;;  %s1092_s17 = smov (!%p345_p6), 127  }
  0x10   : > { %s1093_s18 = smov (!%p345_p6), 15   ;;  %s1094_s21 = smov (!%p345_p6), 1  }
  0x11   : > { %s1095_s23 = smov (!%p345_p6), 17   ;;  %s1559_s24 = smov (!%p345_p6), 16  }
  0x12   : > { %s1567_s27 = smov (!%p394_p7, %s993_s27), 3  ;;  %v1199_v1 = vstv %s413_s28  ;;  %v448_v12 = vlaneseq  ;;  %v1250_v17 = vld [vmem:[%s1555_s8 + $0x10] ss:$8 sm:$0x3]  ;;  %vm596_vm3 = vcmask 1043456   ;;  %v575_v59 = vld [vmem:[%s1550_s3] sm:$0xff] }
  0x13   : > { %s1191_s29 = sshll.u32 %s1567_s27, 3  ;;  %v1255_v18 = vld [vmem:[%s1555_s8 + $0x7] ss:$8 sm:$0x3]  ;;  %v559_v20 = vperm.slane %v1250_v17, 0  ;;  %v560_v21 = vperm.slane %v1250_v17, 1 }
  0x14   : > { %s397_s13 = scalar_lea.vmem %s1548_s1, %s1191_s29  ;;  %v1245_v15 = vand.u32 127, %v448_v12  ;;  %v1261_v19 = vld [vmem:[%s1555_s8 + $0x6] ss:$8 sm:$0x3]  ;;  %v545_v22 = vperm.slane %v1255_v18, 0  ;;  %v546_v23 = vperm.slane %v1255_v18, 1 }
  0x15   : > { %v1197_v0 = vld [vmem:[%s397_s13] sm:$0xff]  ;;  %v1201_v2 = vld [vmem:[%s397_s13 + $0x8] sm:$0xff]  ;;  %v531_v24 = vperm.slane %v1261_v19, 0  ;;  %v532_v25 = vperm.slane %v1261_v19, 1  ;;  %vm592_vm9 = vcmask 588800   ;;  %s383_s28 = sand.u32 1, %s1079_s19   ;;  %s403_s13 = scalar_lea.vmem %s1556_s9, %s1191_s29 }
  0x16   : > { %v433_v3 = vmax.f32 %v1197_v0, 0.0  ;;  %v435_v4 = vmin.f32 %v1197_v0, 0.0  ;;  %v436_v6 = vmin.f32 %v1201_v2, 0.0  ;;  %v434_v8 = vmax.f32 %v1201_v2, 0.0  ;;  %v576_v60 = vld [vmem:[%s1550_s3 + $0x8] sm:$0xff]  ;;  %s992_s30 = sshll.u32 %s383_s28, 5  ;;  %s410_s28 = scalar_lea.vmem %s1558_s11, %s1191_s29 }
  0x17   : > { %vm541_vm0 = vcmp.lt.s32.totalorder %v1245_v15, 112  ;;  %vm527_vm1 = vcmp.lt.s32.totalorder %v1245_v15, 113  ;;  %vm555_vm2 = vcmp.lt.s32.totalorder %v1245_v15, 111  ;;  %v1274_v28 = vld [vmem:[%s1555_s8 + $0x4] ss:$8 sm:$0x3] }
  0x18   : > { %v438_v5 = vmul.f32 %v1199_v1, %v435_v4  ;;  %v439_v9 = vmul.f32 %v1199_v1, %v436_v6  ;;  %v1295_v37 = vld [vmem:[%s1555_s8 + $0x5] ss:$8 sm:$0x3]  ;;  %v503_v38 = vperm.slane %v1274_v28, 0  ;;  %v504_v39 = vperm.slane %v1274_v28, 1  ;;  %s1405_s12 = scalar_lea.vmem [#allocation3], %s992_s30 }
  0x19   : > { %vm513_vm4 = vcmp.lt.s32.totalorder %v1245_v15, 127  ;;  %v517_v49 = vperm.slane %v1295_v37, 0  ;;  %v518_v50 = vperm.slane %v1295_v37, 1  ;;  %v1335_v63 = vld [vmem:[%s1555_s8 + $0x3] ss:$8 sm:$0x3] }
  0x1a   : > { %v1207_v7 = vadd.f32 %v438_v5, %v433_v3  ;;  %v1217_v10 = vadd.f32 %v439_v9, %v434_v8  ;;  %v1097_v3 = vmov 0   ;;  %v1340_v4 = vld [vmem:[%s1555_s8 + $0x2] ss:$8 sm:$0x3]  ;;  %vm492_vm5 = vcmp.lt.s32.totalorder %v1245_v15, 1 }
  0x1b   : > { %1062 = vset.pattern.permute.xlu1 %v1097_v3  ;;  %1063 = vset.pattern.permute.xlu2 %v1097_v3  ;;  %v497_v9 = vperm.slane %v1335_v63, 1  ;;  %vm478_vm6 = vcmp.lt.s32.totalorder %v1245_v15, 15  ;;  %vm450_vm7 = vcmp.lt.s32.totalorder %v1245_v15, 17  ;;  %vm464_vm8 = vcmp.lt.s32.totalorder %v1245_v15, 16  ;;  %v706_v15 = vld [vmem:[%s1553_s6] sm:$0xf] }
  0x1c   : > { %523 = vrot.lane.b32.xlu1 %v1207_v7, %s1089_s14  ;;  %551 = vrot.lane.b32.xlu0 %v1207_v7, %s1090_s15  ;;  %v507_v54 = vmul.f32 %v503_v38, %v1207_v7  ;;  %v508_v55 = vmul.f32 %v504_v39, %v1217_v10  ;;  %vm672_vm10 = vcmask 130048  }
  0x1d   : > { %537 = vrot.lane.b32.xlu2 %v1207_v7, %s1091_s16  ;;  %1064 = vset.pattern.permute.xlu0 %v1097_v3 }
  0x24   : > { %525 = vrot.lane.b32.xlu1 %v1217_v10, %s1089_s14  ;;  %553 = vrot.lane.b32.xlu0 %v1217_v10, %s1090_s15 }
  0x25   : > { %539 = vrot.lane.b32.xlu2 %v1217_v10, %s1091_s16 }
  0x2c   : > { %511 = vrot.lane.b32.xlu1 %v1217_v10, %s1092_s17  ;;  %509 = vrot.lane.b32.xlu0 %v1207_v7, %s1092_s17 }
  0x2d   : > { %474 = vrot.lane.b32.xlu2 %v1207_v7, %s1093_s18 }
  0x34   : > { %488 = vrot.lane.b32.xlu1 %v1207_v7, %s1094_s21  ;;  %476 = vrot.lane.b32.xlu0 %v1217_v10, %s1093_s18 }
  0x35   : > { %490 = vrot.lane.b32.xlu2 %v1217_v10, %s1094_s21 }
  0x3c   : > { %446 = vrot.lane.b32.xlu1 %v1217_v10, %s1095_s23  ;;  %444 = vrot.lane.b32.xlu0 %v1207_v7, %s1095_s23 }
  0x3d   : > { %460 = vrot.lane.b32.xlu2 %v1207_v7, %s1559_s24  ;;  %v496_v7 = vperm.slane %v1335_v63, 0 }
  0x44   : > { %462 = vrot.lane.b32.xlu0 %v1217_v10, %s1559_s24  ;;  %579 = vperm.xlu1 %1062, %v575_v59   ;;  %v482_v10 = vperm.slane %v1340_v4, 0  ;;  %s1028_s24 = sshll.u32 (%p1186_p4), %s1174_s0, 4 }
  0x45   : > { %584 = vperm.xlu2 %1063, %v576_v60   ;;  %v1026_v60 = vld [vmem:[%s1549_s2] sm:$0xff] }
  0x77   : > { %v538_v11 = vpop.permute.xlu2 %537 }
  0x7f   : > { %v540_v16 = vpop.permute.xlu2 %539 }
  0x80   : > { %v542_v29 = vsel %vm541_vm0, %v538_v11, %v540_v16  ;;  %v543_v33 = vsel %vm541_vm0, %v540_v16, %v538_v11  ;;  %v483_v11 = vperm.slane %v1340_v4, 1 }
  0x81   : > { %v549_v40 = vmul.f32 %v545_v22, %v542_v29  ;;  %v550_v45 = vmul.f32 %v546_v23, %v543_v33 }
  0x87   : > { %v475_v44 = vpop.permute.xlu2 %474 }
  0x8e   : > { %v524_v13 = vpop.permute.xlu1 %523  ;;  %v552_v14 = vpop.permute.xlu0 %551 }
  0x8f   : > { %v491_v8 = vpop.permute.xlu2 %490 }
  0x96   : > { %v526_v26 = vpop.permute.xlu1 %525  ;;  %v554_v27 = vpop.permute.xlu0 %553 }
  0x97   : > { %v528_v30 = vsel %vm527_vm1, %v524_v13, %v526_v26  ;;  %v556_v31 = vsel %vm555_vm2, %v552_v14, %v554_v27  ;;  %v557_v32 = vsel %vm555_vm2, %v554_v27, %v552_v14  ;;  %v529_v34 = vsel %vm527_vm1, %v526_v26, %v524_v13 }
  0x98   : > { %v563_v35 = vmul.f32 %v559_v20, %v556_v31  ;;  %v564_v36 = vmul.f32 %v560_v21, %v557_v32  ;;  %v535_v41 = vmul.f32 %v531_v24, %v528_v30  ;;  %v536_v46 = vmul.f32 %v532_v25, %v529_v34 }
  0x9a   : > { %v573_v42 = vpack.c.bf16 %v563_v35, %v563_v35  ;;  %v574_v43 = vpack.c.bf16 %v564_v36, %v564_v36  ;;  %v571_v53 = vpack.c.bf16 %v549_v40, %v535_v41  ;;  %v572_v58 = vpack.c.bf16 %v550_v45, %v536_v46  ;;  %v1367_v36 = vld [vmem:[%s1555_s8] ss:$8 sm:$0x3]  ;;  %v1372_v40 = vld [vmem:[%s1555_s8 + $0x1] ss:$8 sm:$0x3] }
  0x9b   : > { %v468_v45 = vperm.slane %v1372_v40, 0  ;;  %v469_v46 = vperm.slane %v1372_v40, 1 }
  0x9c   : > { %v598_v47 = vsel %vm596_vm3, %v573_v42, 0  ;;  %v601_v48 = vsel %vm596_vm3, %v574_v43, 0  ;;  %v454_v42 = vperm.slane %v1367_v36, 0  ;;  %v455_v43 = vperm.slane %v1367_v36, 1 }
  0x9d   : > { %606 = vmatpush.bf16.msra.mxu0 %v598_v47  ;;  %620 = vmatpush.bf16.msra.mxu1 %v601_v48 }
  0x9e   : > { %v512_v51 = vpop.permute.xlu1 %511  ;;  %v510_v52 = vpop.permute.xlu0 %509 }
  0x9f   : > { %v514_v56 = vsel %vm513_vm4, %v510_v52, %v512_v51  ;;  %v515_v57 = vsel %vm513_vm4, %v512_v51, %v510_v52 }
  0xa0   : > { %v521_v61 = vmul.f32 %v517_v49, %v514_v56  ;;  %v522_v62 = vmul.f32 %v518_v50, %v515_v57 }
  0xa1   : > { %607 = vmatpush.bf16.msra.mxu0 %v571_v53  ;;  %621 = vmatpush.bf16.msra.mxu1 %v572_v58 }
  0xa2   : > { %v569_v5 = vpack.c.bf16 %v521_v61, %v507_v54  ;;  %v570_v6 = vpack.c.bf16 %v522_v62, %v508_v55  ;;  %v655_v61 = vld [vmem:[%s1552_s5] sm:$0xff] }
  0xa3   : > { %659 = vperm.xlu0 %1064, %v655_v61  }
  0xa5   : > { %608 = vmatpush.bf16.msra.mxu0 %v569_v5  ;;  %622 = vmatpush.bf16.msra.mxu1 %v570_v6 }
  0xa6   : > { %v489_v12 = vpop.permute.xlu1 %488  ;;  %v477_v13 = vpop.permute.xlu0 %476 }
  0xa7   : > { %v493_v14 = vsel %vm492_vm5, %v489_v12, %v491_v8  ;;  %v494_v16 = vsel %vm492_vm5, %v491_v8, %v489_v12  ;;  %v479_v26 = vsel %vm478_vm6, %v475_v44, %v477_v13  ;;  %v480_v27 = vsel %vm478_vm6, %v477_v13, %v475_v44  ;;  %v461_v44 = vpop.permute.xlu2 %460 }
  0xa8   : > { %v500_v29 = vmul.f32 %v496_v7, %v494_v16  ;;  %v501_v30 = vmul.f32 %v497_v9, %v493_v14  ;;  %v486_v31 = vmul.f32 %v482_v10, %v480_v27  ;;  %v487_v32 = vmul.f32 %v483_v11, %v479_v26 }
  0xaa   : > { %v567_v33 = vpack.c.bf16 %v500_v29, %v486_v31  ;;  %v568_v34 = vpack.c.bf16 %v501_v30, %v487_v32 }
  0xac   : > { %609 = vmatpush.bf16.msra.mxu0 %v567_v33  ;;  %623 = vmatpush.bf16.msra.mxu1 %v568_v34 }
  0xae   : > { %v445_v35 = vpop.permute.xlu0 %444  ;;  %v447_v41 = vpop.permute.xlu1 %446 }
  0xaf   : > { %v451_v47 = vsel %vm450_vm7, %v445_v35, %v447_v41  ;;  %v452_v48 = vsel %vm450_vm7, %v447_v41, %v445_v35  ;;  %v585_v12 = vpop.permute.xlu2 %584 }
  0xb0   : > { %v458_v54 = vmul.f32 %v454_v42, %v452_v48  ;;  %v459_v55 = vmul.f32 %v455_v43, %v451_v47 }
  0xb6   : > { %v463_v51 = vpop.permute.xlu0 %462  ;;  %v580_v62 = vpop.permute.xlu1 %579 }
  0xb7   : > { %v465_v52 = vsel %vm464_vm8, %v461_v44, %v463_v51  ;;  %v466_v53 = vsel %vm464_vm8, %v463_v51, %v461_v44 }
  0xb8   : > { %v472_v56 = vmul.f32 %v468_v45, %v466_v53  ;;  %v473_v57 = vmul.f32 %v469_v46, %v465_v52 }
  0xba   : > { %v565_v58 = vpack.c.bf16 %v472_v56, %v458_v54  ;;  %v566_v59 = vpack.c.bf16 %v473_v57, %v459_v55  ;;  %v1027_v57 = vld [vmem:[%s1551_s4] sm:$0xff] }
  0xbc   : > { %610 = vmatpush.bf16.msra.mxu0 %v565_v58  ;;  %624 = vmatpush.bf16.msra.mxu1 %v566_v59 }
  0xbf   : > { %1011 = vmatmul.msk.bf16.vlgmr.msra.gmra.mxu0 %vm592_vm9, %v1026_v60  ;;  %1012 = vmatmul.msk.bf16.vlgmr.msra.gmra.mxu1 %vm592_vm9, %v1026_v60 }
 0x115   : > { %v660_v58 = vpop.permute.xlu0 %659 }
 0x13c   : > { %v612_v3 = vpop.f32.mrf.mxu0  ;;  %v626_v5 = vpop.f32.mrf.mxu1 }
 0x13d   : > { %v613_v6 = vadd.f32 %v612_v3, %v580_v62  ;;  %v627_v8 = vadd.f32 %v626_v5, %v580_v62 }
 0x13f   : > { %631 = vst [vmem:[%s1405_s12] sm:$0xff] %v613_v6  ;;  %v641_v13 = vmin.f32 %v613_v6, 0.0  ;;  %v642_v14 = vmin.f32 %v627_v8, 0.0  ;;  %v638_v30 = vmax.f32 %v627_v8, 0.0  ;;  %v637_v35 = vmax.f32 %v613_v6, 0.0 }
 0x140   : > { %632 = vst [vmem:[%s1405_s12 + $0x8] sm:$0xff] %v627_v8 }
 0x141   : > { %v645_v33 = vmul.f32 %v641_v13, %v1199_v1  ;;  %v646_v34 = vmul.f32 %v642_v14, %v1199_v1 }
 0x143   : > { %v649_v51 = vadd.f32 %v645_v33, %v637_v35  ;;  %v650_v53 = vadd.f32 %v646_v34, %v638_v30 }
 0x144   : > { %v614_v16 = vpop.f32.mrf.mxu0  ;;  %v628_v26 = vpop.f32.mrf.mxu1 }
 0x145   : > { %v615_v27 = vadd.f32 %v614_v16, %v585_v12  ;;  %v629_v29 = vadd.f32 %v628_v26, %v585_v12  ;;  %v656_v26 = vld [vmem:[%s1552_s5 + $0x8] sm:$0xff] }
 0x147   : > { %633 = vst [vmem:[%s1405_s12 + $0x10] sm:$0xff] %v615_v27  ;;  %v643_v31 = vmin.f32 %v615_v27, 0.0  ;;  %v644_v32 = vmin.f32 %v629_v29, 0.0  ;;  %v639_v41 = vmax.f32 %v615_v27, 0.0  ;;  %v640_v47 = vmax.f32 %v629_v29, 0.0 }
 0x148   : > { %634 = vst [vmem:[%s1405_s12 + $0x18] sm:$0xff] %v629_v29 }
 0x149   : > { %v647_v44 = vmul.f32 %v643_v31, %v1199_v1  ;;  %v648_v48 = vmul.f32 %v644_v32, %v1199_v1 }
 0x14b   : > { %v651_v52 = vadd.f32 %v647_v44, %v639_v41  ;;  %v652_v54 = vadd.f32 %v648_v48, %v640_v47 }
 0x14d   : > { %v653_v55 = vpack.c.bf16 %v651_v52, %v649_v51  ;;  %v654_v56 = vpack.c.bf16 %v652_v54, %v650_v53 }
 0x14f   : > { %683 = vmatpush.bf16.msra.mxu2 %v653_v55  ;;  %697 = vmatpush.bf16.msra.mxu3 %v654_v56 }
 0x152   : > { %1017 = vmatmul.msk.bf16.vlgmr.msra.gmra.mxu2 %vm672_vm10, %v1027_v57  ;;  %1018 = vmatmul.msk.bf16.vlgmr.msra.gmra.mxu3 %vm672_vm10, %v1027_v57 }
 0x1d5   : > { %v699_v59 = vpop.f32.mrf.mxu3  ;;  %v685_v60 = vpop.f32.mrf.mxu2 }
 0x1d6   : > { %v700_v61 = vadd.f32 %v699_v59, %v660_v58  ;;  %v686_v62 = vadd.f32 %v685_v60, %v660_v58 }
 0x1d8   : > { %v710_v3 = vmin.f32 %v700_v61, 0.0  ;;  %v709_v5 = vmin.f32 %v686_v62, 0.0  ;;  %v708_v6 = vmax.f32 %v700_v61, 0.0  ;;  %v707_v12 = vmax.f32 %v686_v62, 0.0 }
 0x1da   : > { %v712_v8 = vmul.f32 %v710_v3, %v1199_v1  ;;  %v711_v13 = vmul.f32 %v709_v5, %v1199_v1  ;;  %v791_v1 = vld [vmem:[%s1554_s7] sm:$0xff] }
 0x1dc   : > { %v714_v14 = vadd.f32 %v712_v8, %v708_v6  ;;  %v713_v16 = vadd.f32 %v711_v13, %v707_v12 }
 0x1de   : > { %775 = vrot.lane.b32.xlu2 %v714_v14, %s1090_s15  ;;  %765 = vrot.lane.b32.xlu0 %v713_v16, %s1091_s16  ;;  %v747_v19 = vmul.f32 %v713_v16, %v503_v38 }
 0x1df   : > { %773 = vrot.lane.b32.xlu1 %v713_v16, %s1090_s15 }
 0x1e6   : > { %759 = vrot.lane.b32.xlu2 %v714_v14, %s1089_s14  ;;  %751 = vrot.lane.b32.xlu0 %v714_v14, %s1092_s17 }
 0x1e7   : > { %757 = vrot.lane.b32.xlu1 %v713_v16, %s1089_s14  ;;  %s1562_s14 = smov 16  }
 0x1ee   : > { %749 = vrot.lane.b32.xlu2 %v713_v16, %s1092_s17  ;;  %739 = vrot.lane.b32.xlu0 %v713_v16, %s1094_s21 }
 0x1ef   : > { %767 = vrot.lane.b32.xlu1 %v714_v14, %s1091_s16 }
 0x1f6   : > { %733 = vrot.lane.b32.xlu2 %v714_v14, %s1093_s18  ;;  %717 = vrot.lane.b32.xlu0 %v714_v14, %s1095_s23 }
 0x1f7   : > { %731 = vrot.lane.b32.xlu1 %v713_v16, %s1093_s18 }
 0x1fe   : > { %715 = vrot.lane.b32.xlu2 %v713_v16, %s1095_s23  ;;  %794 = vperm.xlu0 %1064, %v791_v1  }
 0x1ff   : > { %741 = vrot.lane.b32.xlu1 %v714_v14, %s1094_s21 }
 0x206   : > { %725 = vrot.lane.b32.xlu2 %v714_v14, %s1562_s14 }
 0x207   : > { %723 = vrot.lane.b32.xlu1 %v713_v16, %s1562_s14  ;;  %s859_s14 = scalar_lea.vmem (%p1186_p4), %s1557_s10, %s1028_s24 }
 0x20f   : > { %664 = vperm.xlu1 %1062, %v656_v26  }
 0x238   : > { %v776_v27 = vpop.permute.xlu2 %775 }
 0x240   : > { %v760_v29 = vpop.permute.xlu2 %759 }
 0x248   : > { %v750_v52 = vpop.permute.xlu2 %749 }
 0x250   : > { %v766_v35 = vpop.permute.xlu0 %765  ;;  %v734_v62 = vpop.permute.xlu2 %733 }
 0x251   : > { %v774_v30 = vpop.permute.xlu1 %773 }
 0x252   : > { %v777_v31 = vsel %vm555_vm2, %v774_v30, %v776_v27  ;;  %v778_v32 = vsel %vm555_vm2, %v776_v27, %v774_v30 }
 0x253   : > { %v779_v33 = vmul.f32 %v777_v31, %v559_v20  ;;  %v780_v34 = vmul.f32 %v778_v32, %v560_v21 }
 0x255   : > { %v789_v41 = vpack.c.bf16 %v779_v33, %v779_v33  ;;  %v790_v44 = vpack.c.bf16 %v780_v34, %v780_v34 }
 0x257   : > { %v801_v47 = vsel %vm596_vm3, %v789_v41, 0  ;;  %v804_v48 = vsel %vm596_vm3, %v790_v44, 0 }
 0x258   : > { %809 = vmatpush.bf16.msrb.mxu2 %v801_v47  ;;  %822 = vmatpush.bf16.msrb.mxu3 %v804_v48  ;;  %v752_v53 = vpop.permute.xlu0 %751 }
 0x259   : > { %v758_v51 = vpop.permute.xlu1 %757  ;;  %v753_v21 = vsel %vm513_vm4, %v750_v52, %v752_v53  ;;  %v754_v55 = vsel %vm513_vm4, %v752_v53, %v750_v52 }
 0x25a   : > { %v761_v54 = vsel %vm527_vm1, %v758_v51, %v760_v29  ;;  %v762_v20 = vsel %vm527_vm1, %v760_v29, %v758_v51  ;;  %v755_v3 = vmul.f32 %v753_v21, %v517_v49  ;;  %v756_v5 = vmul.f32 %v754_v55, %v518_v50  ;;  %v716_v49 = vpop.permute.xlu2 %715 }
 0x25b   : > { %v763_v58 = vmul.f32 %v761_v54, %v531_v24  ;;  %v764_v59 = vmul.f32 %v762_v20, %v532_v25  ;;  %v872_v54 = vld [vmem:[%s1405_s12] sm:$0xff] (%p1186_p4)  ;;  %v874_v20 = vld [vmem:[%s1405_s12 + $0x8] sm:$0xff] (%p1186_p4) }
 0x25c   : > { %v785_v18 = vpack.c.bf16 %v755_v3, %v747_v19  ;;  %873 = vst [vmem:[%s859_s14] sm:$0xff] (%p1186_p4), %v872_v54 }
 0x25d   : > { %875 = vst [vmem:[%s859_s14 + $0x8] sm:$0xff] (%p1186_p4), %v874_v20 }
 0x260   : > { %v740_v25 = vpop.permute.xlu0 %739 }
 0x261   : > { %v768_v17 = vpop.permute.xlu1 %767 }
 0x262   : > { %v769_v56 = vsel %vm541_vm0, %v766_v35, %v768_v17  ;;  %v770_v57 = vsel %vm541_vm0, %v768_v17, %v766_v35  ;;  %v726_v4 = vpop.permute.xlu2 %725  ;;  %v687_v35 = vpop.f32.mrf.mxu2 }
 0x263   : > { %v771_v60 = vmul.f32 %v769_v56, %v545_v22  ;;  %v772_v61 = vmul.f32 %v770_v57, %v546_v23  ;;  %v748_v22 = vmul.f32 %v714_v14, %v504_v39 }
 0x265   : > { %v787_v6 = vpack.c.bf16 %v771_v60, %v763_v58  ;;  %v788_v8 = vpack.c.bf16 %v772_v61, %v764_v59  ;;  %v786_v23 = vpack.c.bf16 %v756_v5, %v748_v22 }
 0x267   : > { %810 = vmatpush.bf16.msrb.mxu2 %v787_v6  ;;  %823 = vmatpush.bf16.msrb.mxu3 %v788_v8 }
 0x268   : > { %v718_v1 = vpop.permute.xlu0 %717 }
 0x269   : > { %v732_v24 = vpop.permute.xlu1 %731  ;;  %v719_v29 = vsel %vm450_vm7, %v716_v49, %v718_v1 }
 0x26a   : > { %v735_v37 = vsel %vm478_vm6, %v732_v24, %v734_v62  ;;  %v736_v50 = vsel %vm478_vm6, %v734_v62, %v732_v24  ;;  %v722_v30 = vmul.f32 %v719_v29, %v455_v43 }
 0x26b   : > { %811 = vmatpush.bf16.msrb.mxu2 %v785_v18  ;;  %824 = vmatpush.bf16.msrb.mxu3 %v786_v23  ;;  %v737_v39 = vmul.f32 %v736_v50, %v482_v10  ;;  %v738_v13 = vmul.f32 %v735_v37, %v483_v11  ;;  %v720_v10 = vsel %vm450_vm7, %v718_v1, %v716_v49 }
 0x270   : > { %v795_v40 = vpop.permute.xlu0 %794 }
 0x271   : > { %v742_v12 = vpop.permute.xlu1 %741 }
 0x272   : > { %v743_v38 = vsel %vm492_vm5, %v740_v25, %v742_v12  ;;  %v744_v28 = vsel %vm492_vm5, %v742_v12, %v740_v25 }
 0x273   : > { %v745_v14 = vmul.f32 %v744_v28, %v496_v7  ;;  %v746_v16 = vmul.f32 %v743_v38, %v497_v9  ;;  %v721_v9 = vmul.f32 %v720_v10, %v454_v42  ;;  %v701_v42 = vpop.f32.mrf.mxu3 }
 0x275   : > { %v783_v26 = vpack.c.bf16 %v745_v14, %v737_v39  ;;  %v784_v27 = vpack.c.bf16 %v746_v16, %v738_v13 }
 0x277   : > { %812 = vmatpush.bf16.msrb.mxu2 %v783_v26  ;;  %825 = vmatpush.bf16.msrb.mxu3 %v784_v27 }
 0x279   : > { %v724_v11 = vpop.permute.xlu1 %723 }
 0x27a   : > { %v727_v7 = vsel %vm464_vm8, %v724_v11, %v726_v4  ;;  %v728_v63 = vsel %vm464_vm8, %v726_v4, %v724_v11 }
 0x27b   : > { %v729_v31 = vmul.f32 %v728_v63, %v468_v45  ;;  %v730_v32 = vmul.f32 %v727_v7, %v469_v46 }
 0x27d   : > { %v781_v33 = vpack.c.bf16 %v729_v31, %v721_v9  ;;  %v782_v34 = vpack.c.bf16 %v730_v32, %v722_v30 }
 0x27f   : > { %813 = vmatpush.bf16.msrb.mxu2 %v781_v33  ;;  %826 = vmatpush.bf16.msrb.mxu3 %v782_v34 }
 0x281   : > { %v665_v36 = vpop.permute.xlu1 %664 }
 0x282   : > { %v688_v43 = vadd.f32 %v687_v35, %v665_v36  ;;  %v702_v45 = vadd.f32 %v701_v42, %v665_v36  ;;  %1019 = vmatmul.msk.bf16.vlgmr.msrb.gmra.mxu2 %vm592_vm9, %v706_v15  ;;  %1020 = vmatmul.msk.bf16.vlgmr.msrb.gmra.mxu3 %vm592_vm9, %v706_v15 }
 0x284   : > { %704 = vst [vmem:[%s410_s28] sm:$0xff] %v688_v43 }
 0x285   : > { %705 = vst [vmem:[%s410_s28 + $0x8] sm:$0xff] %v702_v45 }
 0x305   : > { %v815_v46 = vpop.f32.mrf.mxu2  ;;  %v828_v41 = vpop.f32.mrf.mxu3 }
 0x306   : > { %v816_v44 = vadd.f32 %v815_v46, %v795_v40  ;;  %v829_v47 = vadd.f32 %v828_v41, %v795_v40 }
 0x308   : > { %v832_v48 = vadd.f32 %v816_v44, %v1197_v0  ;;  %v833_v51 = vadd.f32 %v829_v47, %v1201_v2  ;;  %v876_v0 = vld [vmem:[%s1405_s12 + $0x10] sm:$0xff] (%p1186_p4)  ;;  %v878_v2 = vld [vmem:[%s1405_s12 + $0x18] sm:$0xff] (%p1186_p4) }
 0x309   : > { %856 = sbr.rel (!%p1186_p4) target bundleno = 782 (0x30e), region = 64  ;;  %877 = vst [vmem:[%s859_s14 + $0x20] sm:$0xff] (%p1186_p4), %v876_v0 }
 0x30a   : > { %834 = vst [vmem:[%s403_s13] sm:$0xff] %v832_v48 }
 0x30b   : > { %835 = vst [vmem:[%s403_s13 + $0x8] sm:$0xff] %v833_v51 }
 0x30c   : > { %879 = vst [vmem:[%s859_s14 + $0x28] sm:$0xff] (%p1186_p4), %v878_v2 }
 0x30d   : > { %v817_v52 = vpop.f32.mrf.mxu2  ;;  %v830_v53 = vpop.f32.mrf.mxu3 }
 0x30e PF: > { %p20_p8 = scmp.ge.s32.totalorder %s1176_s22, 4   ;;  %s1563_s19 = smov %s1083_s20 }
 0x30f   : > { %s1564_s20 = smov %s1184_s25  ;;  %s1565_s21 = smov %s1176_s22 }
 0x310   :  { %22 = sbr.rel (!%p20_p8) target bundleno = 4 (0x4), region = 141 }

</bundles_post_ra>
